<compile_context>
chip_gen: v7x
topology: tpu7x:2x2x1
jax: 0.10.0
libtpu: 0.0.40
codegen_flags: <defaults>
</compile_context>

<pallas_src>
import functools

import jax
import jax.numpy as jnp
from jax.experimental import pallas as pl
from jax.experimental.pallas import tpu as pltpu


# --------------------------- fused Pallas kernel ------------------------------------

def _fused_unet_kernel(up_ref, x_ref, wtr_ref, btr_ref, wx_ref, bx_ref,
                       yu_ref, yx_ref, su_ref, ssqu_ref, sx_ref, ssqx_ref):
    # up_ref : [up_in, ts_low]        x_ref : [x_in, 4*ts_low]
    # wtr_ref: [4*up_out, up_in]      wx_ref: [x_out, x_in]
    # btr_ref: [4*up_out, 1]          bx_ref: [x_out, 1]
    # ConvTranspose2d(k=2, s=2) as a matmul over the 4 output sub-pixels (rows are
    # ordered (co, kh, kw)).
    yu = jnp.dot(wtr_ref[...], up_ref[...], preferred_element_type=jnp.float32)
    yu = jnp.maximum(yu + btr_ref[...], 0.0)
    yu_ref[...] = yu
    su_ref[...] = jnp.sum(yu, axis=1, keepdims=True)
    ssqu_ref[...] = jnp.sum(yu * yu, axis=1, keepdims=True)

    # 1x1 conv on the skip connection (already at the high resolution).
    yx = jnp.dot(wx_ref[...], x_ref[...], preferred_element_type=jnp.float32)
    yx = jnp.maximum(yx + bx_ref[...], 0.0)
    yx_ref[...] = yx
    sx_ref[...] = jnp.sum(yx, axis=1, keepdims=True)
    ssqx_ref[...] = jnp.sum(yx * yx, axis=1, keepdims=True)


def _pick_spatial_block(s, target):
    """Largest divisor of s that is <= target and lane aligned (multiple of 128);
    fall back to the full extent, which is always legal."""
    if s <= target:
        return s
    for t in range(target, 0, -1):
        if s % t == 0 and t % 128 == 0:
            return t
    return s


def fused_convs_relu_stats(up3, x3, w_tr_t, b_tr_col, w_x_t, b_x_col, *, ts_low):
    n, up_in, s_low = up3.shape
    _, x_in, s_high = x3.shape
    c_up4 = w_tr_t.shape[0]          # 4 * up_out
    x_out = w_x_t.shape[0]
    nb = s_low // ts_low
    ts_high = 4 * ts_low

    out_shape = (
        jax.ShapeDtypeStruct((n, c_up4, s_low), jnp.float32),    # yu  (ReLU'd up half)
        jax.ShapeDtypeStruct((n, x_out, s_high), jnp.float32),   # yx  (ReLU'd x half)
        jax.ShapeDtypeStruct((n, nb, c_up4, 1), jnp.float32),    # per-tile sum   (up)
        jax.ShapeDtypeStruct((n, nb, c_up4, 1), jnp.float32),    # per-tile sumsq (up)
        jax.ShapeDtypeStruct((n, nb, x_out, 1), jnp.float32),    # per-tile sum   (x)
        jax.ShapeDtypeStruct((n, nb, x_out, 1), jnp.float32),    # per-tile sumsq (x)
    )
    stat_u_spec = pl.BlockSpec((None, None, c_up4, 1), lambda b, i: (b, i, 0, 0))
    stat_x_spec = pl.BlockSpec((None, None, x_out, 1), lambda b, i: (b, i, 0, 0))

    return pl.pallas_call(
        _fused_unet_kernel,
        out_shape=out_shape,
        grid_spec=pltpu.PrefetchScalarGridSpec(
            num_scalar_prefetch=0,
            grid=(n, nb),
            in_specs=[
                pl.BlockSpec((None, up_in, ts_low), lambda b, i: (b, 0, i)),
                pl.BlockSpec((None, x_in, ts_high), lambda b, i: (b, 0, i)),
                pl.BlockSpec((c_up4, up_in), lambda b, i: (0, 0)),
                pl.BlockSpec((c_up4, 1), lambda b, i: (0, 0)),
                pl.BlockSpec((x_out, x_in), lambda b, i: (0, 0)),
                pl.BlockSpec((x_out, 1), lambda b, i: (0, 0)),
            ],
            out_specs=(
                pl.BlockSpec((None, c_up4, ts_low), lambda b, i: (b, 0, i)),
                pl.BlockSpec((None, x_out, ts_high), lambda b, i: (b, 0, i)),
                stat_u_spec, stat_u_spec, stat_x_spec, stat_x_spec,
            ),
        ),
        compiler_params=pltpu.CompilerParams(
            dimension_semantics=("parallel", "parallel"),
            vmem_limit_bytes=64 * 1024 * 1024,
        ),
    )(up3, x3, w_tr_t, b_tr_col, w_x_t, b_x_col)


# ------------------------------- UnetBlock wrapper ----------------------------------

def init_params(key, up_in, x_in, n_out):
    up_out = x_out = n_out // 2
    ks = jax.random.split(key, 6)
    # PyTorch parameter shapes (values are synthetic / deterministic):
    w_tr = jax.random.normal(ks[0], (up_in, up_out, 2, 2), jnp.float32) * 0.1
    b_tr = jax.random.normal(ks[1], (up_out,), jnp.float32) * 0.1
    w_x = jax.random.normal(ks[2], (x_out, x_in, 1, 1), jnp.float32) * 0.1
    b_x = jax.random.normal(ks[3], (x_out,), jnp.float32) * 0.1
    gamma = 1.0 + 0.1 * jax.random.normal(ks[4], (n_out,), jnp.float32)
    beta = 0.1 * jax.random.normal(ks[5], (n_out,), jnp.float32)
    return dict(w_tr=w_tr, b_tr=b_tr, w_x=w_x, b_x=b_x, gamma=gamma, beta=beta)


@functools.partial(jax.jit, static_argnames=("ts_target", "eps"))
def unet_block_forward(up_p, x_p, params, *, ts_target=1024, eps=1e-5):
    """up_p: [N, up_in, H, W] (NCHW), x_p: [N, x_in, 2H, 2W] (NCHW) -> [N, n_out, 2H, 2W]."""
    n, up_in, h, w = up_p.shape
    n2, x_in, h2, w2 = x_p.shape
    assert n2 == n and h2 == 2 * h and w2 == 2 * w, (up_p.shape, x_p.shape)
    w_tr, b_tr = params["w_tr"], params["b_tr"]
    w_x, b_x = params["w_x"], params["b_x"]
    up_out = w_tr.shape[1]
    x_out = w_x.shape[0]

    s_low, s_high = h * w, h2 * w2
    ts_low = _pick_spatial_block(s_low, ts_target)

    # NCHW -> (N, C, S): pure reshapes, no data movement.
    up3 = up_p.reshape(n, up_in, s_low)
    x3 = x_p.reshape(n, x_in, s_high)

    # ConvTranspose2d weight [ci, co, kh, kw] -> [(co, kh, kw), ci]; bias per row.
    w_tr_t = jnp.transpose(w_tr, (1, 2, 3, 0)).reshape(4 * up_out, up_in)
    b_tr_col = jnp.repeat(b_tr, 4).reshape(4 * up_out, 1)
    w_x_t = w_x[:, :, 0, 0]                                  # [x_out, x_in]
    b_x_col = b_x.reshape(x_out, 1)

    yu, yx, su_p, ssqu_p, sx_p, ssqx_p = fused_convs_relu_stats(
        up3, x3, w_tr_t, b_tr_col, w_x_t, b_x_col, ts_low=ts_low)

    # ---- finalize BN batch statistics (tiny, per-channel) -------------------------
    m = jnp.float32(n * s_high)
    su = jnp.sum(su_p, axis=(0, 1)).reshape(up_out, 4).sum(axis=1)
    ssqu = jnp.sum(ssqu_p, axis=(0, 1)).reshape(up_out, 4).sum(axis=1)
    sx = jnp.sum(sx_p, axis=(0, 1)).reshape(x_out)
    ssqx = jnp.sum(ssqx_p, axis=(0, 1)).reshape(x_out)

    mean_u = su / m
    var_u = ssqu / m - mean_u * mean_u           # biased var (PyTorch training BN)
    mean_x = sx / m
    var_x = ssqx / m - mean_x * mean_x

    gamma, beta = params["gamma"], params["beta"]
    scale_u = gamma[:up_out] * jax.lax.rsqrt(var_u + eps)
    shift_u = beta[:up_out] - mean_u * scale_u
    scale_x = gamma[up_out:] * jax.lax.rsqrt(var_x + eps)
    shift_x = beta[up_out:] - mean_x * scale_x

    # ---- BN apply + 2x2 sub-pixel rearrangement + channel concat (plain JAX so XLA
    #      fuses it with the one unavoidable read/write pass over each half) --------
    yu6 = yu.reshape(n, up_out, 2, 2, h, w)      # dims: (n, co, kh, kw, h, w)
    yu6 = yu6 * scale_u[None, :, None, None, None, None] \
        + shift_u[None, :, None, None, None, None]
    out_u = jnp.transpose(yu6, (0, 1, 4, 2, 5, 3)).reshape(n, up_out, h2, w2)

    out_x = yx.reshape(n, x_out, h2, w2) \
        * scale_x[None, :, None, None] + shift_x[None, :, None, None]

    return jnp.concatenate([out_u, out_x], axis=1)


# ------------------------------- reference (pure JAX) --------------------------------

def unet_block_reference(up_p, x_p, params, eps=1e-5):
    hi = jax.lax.Precision.HIGHEST
    w_tr, b_tr = params["w_tr"], params["b_tr"]            # (ci, co, 2, 2), (co,)
    n, _, h, w = up_p.shape
    co = w_tr.shape[1]
    # PyTorch ConvTranspose2d(k=2, s=2, pad=0):
    #   out[n, co, 2h+kh, 2w+kw] = sum_ci in[n, ci, h, w] * W[ci, co, kh, kw] + b[co]
    t = jnp.einsum("nchw,cokl->nohkwl", up_p, w_tr, precision=hi)
    tr = t.reshape(n, co, 2 * h, 2 * w) + b_tr[None, :, None, None]
    xc = jnp.einsum("nchw,oc->nohw", x_p, params["w_x"][:, :, 0, 0],
                    precision=hi) + params["b_x"][None, :, None, None]
    cat = jnp.concatenate([tr, xc], axis=1)
    r = jnp.maximum(cat, 0.0)
    mean = jnp.mean(r, axis=(0, 2, 3), keepdims=True)
    var = jnp.mean((r - mean) ** 2, axis=(0, 2, 3), keepdims=True)
    g = params["gamma"][None, :, None, None]
    b = params["beta"][None, :, None, None]
    return (r - mean) / jnp.sqrt(var + eps) * g + b


if __name__ == "__main__":
    N, up_in, x_in, n_out = 2, 8, 4, 8
    H = W = 8                          # tr_conv output / x_p spatial = 16x16
    key = jax.random.PRNGKey(0)
    k1, k2, k3 = jax.random.split(key, 3)

    up_p = jax.random.normal(k1, (N, up_in, H, W), jnp.float32)
    x_p = jax.random.normal(k2, (N, x_in, 2 * H, 2 * W), jnp.float32)
    params = init_params(k3, up_in, x_in, n_out)

    out = unet_block_forward(up_p, x_p, params)
    out = jax.block_until_ready(out)

    ref = unet_block_reference(up_p, x_p, params)
    assert out.shape == (N, n_out, 2 * H, 2 * W), out.shape
    err = float(jnp.max(jnp.abs(out - ref)))
    assert err < 1e-3, err
    print("KERNEL_OK")
</pallas_src>

<mosaic_0001>
module attributes {stable_mosaic.version = 11 : i64} {
  func.func @_fused_unet_kernel(%arg0: i32, %arg1: i32, %arg2: memref<1x8x64xf32, #tpu.memory_space<vmem>>, %arg3: memref<1x4x256xf32, #tpu.memory_space<vmem>>, %arg4: memref<16x8xf32, #tpu.memory_space<vmem>>, %arg5: memref<16x1xf32, #tpu.memory_space<vmem>>, %arg6: memref<4x4xf32, #tpu.memory_space<vmem>>, %arg7: memref<4x1xf32, #tpu.memory_space<vmem>>, %arg8: memref<1x16x64xf32, #tpu.memory_space<vmem>>, %arg9: memref<1x4x256xf32, #tpu.memory_space<vmem>>, %arg10: memref<1x1x16x1xf32, #tpu.memory_space<vmem>>, %arg11: memref<1x1x16x1xf32, #tpu.memory_space<vmem>>, %arg12: memref<1x1x4x1xf32, #tpu.memory_space<vmem>>, %arg13: memref<1x1x4x1xf32, #tpu.memory_space<vmem>>) attributes {dimension_semantics = [#tpu.dimension_semantics<parallel>, #tpu.dimension_semantics<parallel>], iteration_bounds = array<i64: 2, 1>, scalar_prefetch = 0 : i64, scratch_operands = 0 : i64, tpu.core_type = #tpu.core_type<tc>, window_params = [{transform_indices = @transform_0, window_bounds = array<i64: 1, 8, 64>}, {transform_indices = @transform_1, window_bounds = array<i64: 1, 4, 256>}, {pipeline_mode = #tpu.pipeline_mode<synchronous>, transform_indices = @transform_2, window_bounds = array<i64: 16, 8>}, {pipeline_mode = #tpu.pipeline_mode<synchronous>, transform_indices = @transform_3, window_bounds = array<i64: 16, 1>}, {pipeline_mode = #tpu.pipeline_mode<synchronous>, transform_indices = @transform_4, window_bounds = array<i64: 4, 4>}, {pipeline_mode = #tpu.pipeline_mode<synchronous>, transform_indices = @transform_5, window_bounds = array<i64: 4, 1>}, {transform_indices = @transform_6, window_bounds = array<i64: 1, 16, 64>}, {transform_indices = @transform_7, window_bounds = array<i64: 1, 4, 256>}, {transform_indices = @transform_8, window_bounds = array<i64: 1, 1, 16, 1>}, {transform_indices = @transform_9, window_bounds = array<i64: 1, 1, 16, 1>}, {transform_indices = @transform_10, window_bounds = array<i64: 1, 1, 4, 1>}, {transform_indices = @transform_11, window_bounds = array<i64: 1, 1, 4, 1>}]} {
    %c0 = arith.constant 0 : index
    %c0_0 = arith.constant 0 : index
    %0 = vector.load %arg4[%c0, %c0_0] : memref<16x8xf32, #tpu.memory_space<vmem>>, vector<16x8xf32>
    %c0_1 = arith.constant 0 : index
    %c0_2 = arith.constant 0 : index
    %c0_3 = arith.constant 0 : index
    %1 = vector.load %arg2[%c0_1, %c0_2, %c0_3] : memref<1x8x64xf32, #tpu.memory_space<vmem>>, vector<1x8x64xf32>
    %2 = vector.shape_cast %1 : vector<1x8x64xf32> to vector<8x64xf32>
    %cst = arith.constant dense<0.000000e+00> : vector<16x64xf32>
    %3 = tpu.matmul %0, %2, %cst {dimension_numbers = #tpu.dot_dimension_numbers<[1], [0], [0], [1], [0, 0, 1, 1], [], []>} : vector<16x8xf32>, vector<8x64xf32>, vector<16x64xf32> -> vector<16x64xf32>
    %c0_4 = arith.constant 0 : index
    %c0_5 = arith.constant 0 : index
    %4 = vector.load %arg5[%c0_4, %c0_5] : memref<16x1xf32, #tpu.memory_space<vmem>>, vector<16x1xf32>
    %5 = vector.broadcast %4 : vector<16x1xf32> to vector<16x64xf32>
    %6 = arith.addf %3, %5 : vector<16x64xf32>
    %cst_6 = arith.constant 0.000000e+00 : f32
    %7 = vector.broadcast %cst_6 : f32 to vector<16x64xf32>
    %8 = arith.maximumf %6, %7 : vector<16x64xf32>
    %c0_7 = arith.constant 0 : index
    %c0_8 = arith.constant 0 : index
    %c0_9 = arith.constant 0 : index
    %9 = vector.load %arg8[%c0_7, %c0_8, %c0_9] : memref<1x16x64xf32, #tpu.memory_space<vmem>>, vector<1x16x64xf32>
    %10 = vector.shape_cast %9 : vector<1x16x64xf32> to vector<16x64xf32>
    %11 = vector.shape_cast %8 : vector<16x64xf32> to vector<1x16x64xf32>
    tpu.vector_store %arg8[%c0_7, %c0_8, %c0_9], %11 {strides = array<i32>} : memref<1x16x64xf32, #tpu.memory_space<vmem>>, vector<1x16x64xf32>,
    %cst_10 = arith.constant dense<0.000000e+00> : vector<16xf32>
    %12 = vector.multi_reduction <add>, %8, %cst_10 [1] : vector<16x64xf32> to vector<16xf32>
    %13 = vector.shape_cast %12 : vector<16xf32> to vector<16x1xf32>
    %c0_11 = arith.constant 0 : index
    %c0_12 = arith.constant 0 : index
    %c0_13 = arith.constant 0 : index
    %c0_14 = arith.constant 0 : index
    %14 = vector.load %arg10[%c0_11, %c0_12, %c0_13, %c0_14] : memref<1x1x16x1xf32, #tpu.memory_space<vmem>>, vector<1x1x16x1xf32>
    %15 = vector.shape_cast %14 : vector<1x1x16x1xf32> to vector<16x1xf32>
    %16 = vector.shape_cast %13 : vector<16x1xf32> to vector<1x1x16x1xf32>
    tpu.vector_store %arg10[%c0_11, %c0_12, %c0_13, %c0_14], %16 {strides = array<i32>} : memref<1x1x16x1xf32, #tpu.memory_space<vmem>>, vector<1x1x16x1xf32>,
    %17 = arith.mulf %8, %8 : vector<16x64xf32>
    %cst_15 = arith.constant dense<0.000000e+00> : vector<16xf32>
    %18 = vector.multi_reduction <add>, %17, %cst_15 [1] : vector<16x64xf32> to vector<16xf32>
    %19 = vector.shape_cast %18 : vector<16xf32> to vector<16x1xf32>
    %c0_16 = arith.constant 0 : index
    %c0_17 = arith.constant 0 : index
    %c0_18 = arith.constant 0 : index
    %c0_19 = arith.constant 0 : index
    %20 = vector.load %arg11[%c0_16, %c0_17, %c0_18, %c0_19] : memref<1x1x16x1xf32, #tpu.memory_space<vmem>>, vector<1x1x16x1xf32>
    %21 = vector.shape_cast %20 : vector<1x1x16x1xf32> to vector<16x1xf32>
    %22 = vector.shape_cast %19 : vector<16x1xf32> to vector<1x1x16x1xf32>
    tpu.vector_store %arg11[%c0_16, %c0_17, %c0_18, %c0_19], %22 {strides = array<i32>} : memref<1x1x16x1xf32, #tpu.memory_space<vmem>>, vector<1x1x16x1xf32>,
    %c0_20 = arith.constant 0 : index
    %c0_21 = arith.constant 0 : index
    %23 = vector.load %arg6[%c0_20, %c0_21] : memref<4x4xf32, #tpu.memory_space<vmem>>, vector<4x4xf32>
    %c0_22 = arith.constant 0 : index
    %c0_23 = arith.constant 0 : index
    %c0_24 = arith.constant 0 : index
    %24 = vector.load %arg3[%c0_22, %c0_23, %c0_24] : memref<1x4x256xf32, #tpu.memory_space<vmem>>, vector<1x4x256xf32>
    %25 = vector.shape_cast %24 : vector<1x4x256xf32> to vector<4x256xf32>
    %cst_25 = arith.constant dense<0.000000e+00> : vector<4x256xf32>
    %26 = tpu.matmul %23, %25, %cst_25 {dimension_numbers = #tpu.dot_dimension_numbers<[1], [0], [0], [1], [0, 0, 1, 1], [], []>} : vector<4x4xf32>, vector<4x256xf32>, vector<4x256xf32> -> vector<4x256xf32>
    %c0_26 = arith.constant 0 : index
    %c0_27 = arith.constant 0 : index
    %27 = vector.load %arg7[%c0_26, %c0_27] : memref<4x1xf32, #tpu.memory_space<vmem>>, vector<4x1xf32>
    %28 = vector.broadcast %27 : vector<4x1xf32> to vector<4x256xf32>
    %29 = arith.addf %26, %28 : vector<4x256xf32>
    %cst_28 = arith.constant 0.000000e+00 : f32
    %30 = vector.broadcast %cst_28 : f32 to vector<4x256xf32>
    %31 = arith.maximumf %29, %30 : vector<4x256xf32>
    %c0_29 = arith.constant 0 : index
    %c0_30 = arith.constant 0 : index
    %c0_31 = arith.constant 0 : index
    %32 = vector.load %arg9[%c0_29, %c0_30, %c0_31] : memref<1x4x256xf32, #tpu.memory_space<vmem>>, vector<1x4x256xf32>
    %33 = vector.shape_cast %32 : vector<1x4x256xf32> to vector<4x256xf32>
    %34 = vector.shape_cast %31 : vector<4x256xf32> to vector<1x4x256xf32>
    tpu.vector_store %arg9[%c0_29, %c0_30, %c0_31], %34 {strides = array<i32>} : memref<1x4x256xf32, #tpu.memory_space<vmem>>, vector<1x4x256xf32>,
    %cst_32 = arith.constant dense<0.000000e+00> : vector<4xf32>
    %35 = vector.multi_reduction <add>, %31, %cst_32 [1] : vector<4x256xf32> to vector<4xf32>
    %36 = vector.shape_cast %35 : vector<4xf32> to vector<4x1xf32>
    %c0_33 = arith.constant 0 : index
    %c0_34 = arith.constant 0 : index
    %c0_35 = arith.constant 0 : index
    %c0_36 = arith.constant 0 : index
    %37 = vector.load %arg12[%c0_33, %c0_34, %c0_35, %c0_36] : memref<1x1x4x1xf32, #tpu.memory_space<vmem>>, vector<1x1x4x1xf32>
    %38 = vector.shape_cast %37 : vector<1x1x4x1xf32> to vector<4x1xf32>
    %39 = vector.shape_cast %36 : vector<4x1xf32> to vector<1x1x4x1xf32>
    tpu.vector_store %arg12[%c0_33, %c0_34, %c0_35, %c0_36], %39 {strides = array<i32>} : memref<1x1x4x1xf32, #tpu.memory_space<vmem>>, vector<1x1x4x1xf32>,
    %40 = arith.mulf %31, %31 : vector<4x256xf32>
    %cst_37 = arith.constant dense<0.000000e+00> : vector<4xf32>
    %41 = vector.multi_reduction <add>, %40, %cst_37 [1] : vector<4x256xf32> to vector<4xf32>
    %42 = vector.shape_cast %41 : vector<4xf32> to vector<4x1xf32>
    %c0_38 = arith.constant 0 : index
    %c0_39 = arith.constant 0 : index
    %c0_40 = arith.constant 0 : index
    %c0_41 = arith.constant 0 : index
    %43 = vector.load %arg13[%c0_38, %c0_39, %c0_40, %c0_41] : memref<1x1x4x1xf32, #tpu.memory_space<vmem>>, vector<1x1x4x1xf32>
    %44 = vector.shape_cast %43 : vector<1x1x4x1xf32> to vector<4x1xf32>
    %45 = vector.shape_cast %42 : vector<4x1xf32> to vector<1x1x4x1xf32>
    tpu.vector_store %arg13[%c0_38, %c0_39, %c0_40, %c0_41], %45 {strides = array<i32>} : memref<1x1x4x1xf32, #tpu.memory_space<vmem>>, vector<1x1x4x1xf32>,
    return
  }
  func.func @transform_0(%arg0: i32, %arg1: i32) -> (i32, i32, i32) {
    %c0_i32 = arith.constant 0 : i32
    %c0_i32_0 = arith.constant 0 : i32
    return %arg0, %c0_i32, %arg1 : i32, i32, i32
  }
  func.func @transform_1(%arg0: i32, %arg1: i32) -> (i32, i32, i32) {
    %c0_i32 = arith.constant 0 : i32
    %c0_i32_0 = arith.constant 0 : i32
    return %arg0, %c0_i32, %arg1 : i32, i32, i32
  }
  func.func @transform_2(%arg0: i32, %arg1: i32) -> (i32, i32) {
    %c0_i32 = arith.constant 0 : i32
    %c0_i32_0 = arith.constant 0 : i32
    %c0_i32_1 = arith.constant 0 : i32
    return %c0_i32, %c0_i32_0 : i32, i32
  }
  func.func @transform_3(%arg0: i32, %arg1: i32) -> (i32, i32) {
    %c0_i32 = arith.constant 0 : i32
    %c0_i32_0 = arith.constant 0 : i32
    %c0_i32_1 = arith.constant 0 : i32
    return %c0_i32, %c0_i32_0 : i32, i32
  }
  func.func @transform_4(%arg0: i32, %arg1: i32) -> (i32, i32) {
    %c0_i32 = arith.constant 0 : i32
    %c0_i32_0 = arith.constant 0 : i32
    %c0_i32_1 = arith.constant 0 : i32
    return %c0_i32, %c0_i32_0 : i32, i32
  }
  func.func @transform_5(%arg0: i32, %arg1: i32) -> (i32, i32) {
    %c0_i32 = arith.constant 0 : i32
    %c0_i32_0 = arith.constant 0 : i32
    %c0_i32_1 = arith.constant 0 : i32
    return %c0_i32, %c0_i32_0 : i32, i32
  }
  func.func @transform_6(%arg0: i32, %arg1: i32) -> (i32, i32, i32) {
    %c0_i32 = arith.constant 0 : i32
    %c0_i32_0 = arith.constant 0 : i32
    return %arg0, %c0_i32, %arg1 : i32, i32, i32
  }
  func.func @transform_7(%arg0: i32, %arg1: i32) -> (i32, i32, i32) {
    %c0_i32 = arith.constant 0 : i32
    %c0_i32_0 = arith.constant 0 : i32
    return %arg0, %c0_i32, %arg1 : i32, i32, i32
  }
  func.func @transform_8(%arg0: i32, %arg1: i32) -> (i32, i32, i32, i32) {
    %c0_i32 = arith.constant 0 : i32
    %c0_i32_0 = arith.constant 0 : i32
    %c0_i32_1 = arith.constant 0 : i32
    return %arg0, %arg1, %c0_i32, %c0_i32_0 : i32, i32, i32, i32
  }
  func.func @transform_9(%arg0: i32, %arg1: i32) -> (i32, i32, i32, i32) {
    %c0_i32 = arith.constant 0 : i32
    %c0_i32_0 = arith.constant 0 : i32
    %c0_i32_1 = arith.constant 0 : i32
    return %arg0, %arg1, %c0_i32, %c0_i32_0 : i32, i32, i32, i32
  }
  func.func @transform_10(%arg0: i32, %arg1: i32) -> (i32, i32, i32, i32) {
    %c0_i32 = arith.constant 0 : i32
    %c0_i32_0 = arith.constant 0 : i32
    %c0_i32_1 = arith.constant 0 : i32
    return %arg0, %arg1, %c0_i32, %c0_i32_0 : i32, i32, i32, i32
  }
  func.func @transform_11(%arg0: i32, %arg1: i32) -> (i32, i32, i32, i32) {
    %c0_i32 = arith.constant 0 : i32
    %c0_i32_0 = arith.constant 0 : i32
    %c0_i32_1 = arith.constant 0 : i32
    return %arg0, %arg1, %c0_i32, %c0_i32_0 : i32, i32, i32, i32
  }
}

</mosaic_0001>

<bundles_post_ra>
// kernel: unet_block_forward.1
= control target key start
LH: loop header
LB: loop body
LE: loop exit
PB: predicated region body
PF: predicated region fallthrough
CT: control target
= control target key end

     0   :  { %s2503_s0 = inlined_call_operand.hbm [shape: f32[2,8,64], index: 0, kind: input, shape index: {}]   ;;  %s2504_s1 = inlined_call_operand.hbm [shape: f32[2,4,256], index: 1, kind: input, shape index: {}]   ;;  %s2505_s2 = inlined_call_operand.hbm [shape: f32[16,8], index: 2, kind: input, shape index: {}]   ;;  %s2506_s3 = inlined_call_operand.hbm [shape: f32[16,1], index: 3, kind: input, shape index: {}]   ;;  %s2507_s4 = inlined_call_operand.hbm [shape: f32[4,4], index: 4, kind: input, shape index: {}]   ;;  %s2508_s5 = inlined_call_operand.hbm [shape: f32[4,1], index: 5, kind: input, shape index: {}]   ;;  %s2509_s6 = inlined_call_operand.hbm [shape: f32[2,16,64], index: 6, kind: output, shape index: {0}]   ;;  %s2510_s7 = inlined_call_operand.hbm [shape: f32[2,4,256], index: 7, kind: output, shape index: {1}]   ;;  %s2511_s8 = inlined_call_operand.hbm [shape: f32[2,1,16,1], index: 8, kind: output, shape index: {2}]   ;;  %s2512_s9 = inlined_call_operand.hbm [shape: f32[2,1,16,1], index: 9, kind: output, shape index: {3}]   ;;  %s2513_s10 = inlined_call_operand.hbm [shape: f32[2,1,4,1], index: 10, kind: output, shape index: {4}]   ;;  %s2514_s11 = inlined_call_operand.hbm [shape: f32[2,1,4,1], index: 11, kind: output, shape index: {5}]  }
   0x1   :  { %2532 = sst [smem:[#allocation32_spill]] %s2503_s0 }
   0x2   :  { %2533 = sst [smem:[#allocation33_spill]] %s2504_s1 }
   0x3   :  { %2534 = sst [smem:[#allocation34_spill]] %s2505_s2 }
   0x4   :  { %2535 = sst [smem:[#allocation35_spill]] %s2506_s3 }
   0x5   :  { %2536 = sst [smem:[#allocation36_spill]] %s2507_s4 }
   0x6   :  { %2537 = sst [smem:[#allocation37_spill]] %s2508_s5 }
   0x7   :  { %2538 = sst [smem:[#allocation38_spill]] %s2509_s6 }
   0x8   :  { %2539 = sst [smem:[#allocation39_spill]] %s2510_s7 }
   0x9   :  { %2540 = sst [smem:[#allocation40_spill]] %s2511_s8 }
   0xa   :  { %2541 = sst [smem:[#allocation41_spill]] %s2512_s9 }
   0xb   :  { %2542 = sst [smem:[#allocation42_spill]] %s2513_s10 }
   0xc   :  { %2543 = sst [smem:[#allocation43_spill]] %s2514_s11 }
   0xd   :  { %17 = vsyncpa [#allocation3], 0 }
   0xe   :  { %19 = vsyncpa [#allocation3 + $0x1], 0 }
   0xf   :  { %20 = vsyncpa [#allocation6], 0 }
  0x10   :  { %22 = vsyncpa [#allocation6 + $0x1], 0 }
  0x11   :  { %23 = vsyncpa [#allocation9], 0 }
  0x12   :  { %24 = vsyncpa [#allocation12], 0 }
  0x13   :  { %25 = vsyncpa [#allocation4], 0 }
  0x14   :  { %27 = vsyncpa [#allocation4 + $0x1], 0 }
  0x15   :  { %28 = vsyncpa [#allocation15], 0 }
  0x16   :  { %30 = vsyncpa [#allocation15 + $0x1], 0 }
  0x17   :  { %31 = vsyncpa [#allocation18], 0 }
  0x18   :  { %33 = vsyncpa [#allocation18 + $0x1], 0 }
  0x19   :  { %34 = vsyncpa [#allocation21], 0 }
  0x1a   :  { %36 = vsyncpa [#allocation21 + $0x1], 0  ;;  %s1944_s17 = smov 0   ;;  %s1946_s18 = smov 0  }
  0x1b   :  { %s1948_s19 = smov 0   ;;  %s1950_s20 = smov 0  }
  0x1c   :  { %s1952_s21 = smov 0   ;;  %s1954_s22 = smov 0  }
  0x1d LB: > { %s1975_s23 = sadd.s32 4294967295, %s1864_s22   ;;  %p1240_p0 = scmp.ge.s32.totalorder %s1864_s22, 1  ;;  %s1864_s22 = sphi %s1954_s22, %s42_s22   ;;  %s1860_s21 = sphi %s1952_s21, %s2593_s21   ;;  %s1856_s20 = sphi %s1950_s20, %s2592_s20   ;;  %s1852_s19 = sphi %s1948_s19, %s2591_s19   ;;  %s1848_s18 = sphi %s1946_s18, %s2590_s18   ;;  %s1844_s17 = sphi %s1944_s17, %s2589_s17  }
  0x1e   : > { %p2520_p1 = scmp.eq.s32.totalorder %s1975_s23, 0  ;;  %p367_p2 = scmp.lt.s32.totalorder %s1864_s22, 3 }
  0x1f   : > { %s1866_s25 = smov [#allocation7]   ;;  %s1867_s28 = smov [#allocation8]  }
  0x20   : > { %p1980_p3 = pnand %p1240_p0, %p367_p2  ;;  %s379_s26 = sshll.u32 %s1866_s25, 4  ;;  %s1984_s26 = int_to_ptr.vmem [resolvable:$true] %s379_s26 }
  0x21   : > { %s392_s29 = sshll.u32 %s1867_s28, 4  ;;  %s1868_s30 = smov [#allocation10]   ;;  %s1995_s29 = int_to_ptr.vmem [resolvable:$true] %s392_s29 }
  0x22   : > { %s2544_s24 = scalar_select %p1980_p3, 1, 0 }
  0x23   : > { %p1332_p4 = pneg %p1980_p3  ;;  %s1997_s12 = sshll.u32 %s1868_s30, 4  ;;  %s407_s12 = int_to_ptr.vmem [resolvable:$true] %s1997_s12 }
  0x24   : > { %s2546_s2 = sld [smem:[#allocation34_spill]] }
  0x25   : > { %p1991_p6 = pnand %p1332_p4, %p2520_p1 }
  0x27   : > { %p2007_p8 = pneg %p1991_p6 }
  0x2a   : > { %s1442_s15 = scalar_lea.hbm %s2546_s2, 256 }
  0x2b   : > { %p1443_p7 = scmp.ne.s32.totalorder %s2546_s2, %s1442_s15  ;;  %p1449_p11 = scmp.lt.u32.totalorder %s1442_s15, %s2546_s2 }
  0x2d   : > { %p1445_p9 = pnand %p2007_p8, %p1443_p7 }
  0x2f   : > { %p1446_p10 = pneg %p1445_p9 }
  0x31   : > { %p1451_p12 = pnand %p1449_p11, %p1446_p10 }
  0x33   : > { %1454 = shalt.err (!%p1451_p12)
}
  0x34   : > { %s1455_s13 = scalar_lea.vmem %s1984_s26, 256  ;;  %p1463_p4 = scmp.lt.s32.totalorder %s1984_s26, %s1984_s26 }
  0x35   : > { %p1456_p13 = scmp.ne.s32.totalorder %s1984_s26, %s1455_s13  ;;  %p1464_p5 = scmp.lt.s32.totalorder %s1455_s13, %s1455_s13 }
  0x37   : > { %p1458_p0 = pnand %p1456_p13, %p2007_p8  ;;  %p1465_p7 = por %p1464_p5, %p1463_p4 }
  0x39   : > { %p1459_p2 = pneg %p1458_p0 }
  0x3b   : > { %p1466_p9 = pnand %p1465_p7, %p1459_p2 }
  0x3d   : > { %1469 = shalt.err (!%p1466_p9)
}
  0x3e   : > { %s1869_s14 = smov 128   ;;  %s1870_s15 = smov 8  }
  0x3f   : > { %1335 = dma.hbm_to_vmem [thread:$0]  (!%p1991_p6), %s2546_s2, 256, %s1984_s26, [#allocation6], %s1869_s14, %s1869_s14, %s1870_s15  }
  0x40   : > { %s2548_s3 = sld [smem:[#allocation35_spill]] }
  0x46   : > { %s1470_s11 = scalar_lea.hbm %s2548_s3, 256 }
  0x47   : > { %p1471_p5 = scmp.ne.s32.totalorder %s2548_s3, %s1470_s11  ;;  %p1477_p12 = scmp.lt.u32.totalorder %s1470_s11, %s2548_s3 }
  0x49   : > { %p1473_p10 = pnand %p1471_p5, %p2007_p8 }
  0x4b   : > { %p1474_p11 = pneg %p1473_p10 }
  0x4d   : > { %p1479_p13 = pnand %p1477_p12, %p1474_p11 }
  0x4f   : > { %1482 = shalt.err (!%p1479_p13)
}
  0x50   : > { %s1483_s26 = scalar_lea.vmem %s1995_s29, 256  ;;  %p1491_p7 = scmp.lt.s32.totalorder %s1995_s29, %s1995_s29 }
  0x51   : > { %p1484_p0 = scmp.ne.s32.totalorder %s1995_s29, %s1483_s26  ;;  %p1492_p9 = scmp.lt.s32.totalorder %s1483_s26, %s1483_s26 }
  0x53   : > { %p1486_p2 = pnand %p1484_p0, %p2007_p8  ;;  %p1493_p5 = por %p1492_p9, %p1491_p7 }
  0x55   : > { %p1487_p4 = pneg %p1486_p2 }
  0x57   : > { %p1494_p10 = pnand %p1493_p5, %p1487_p4 }
  0x59   : > { %1497 = shalt.err (!%p1494_p10)
}
  0x5a   : > { %1338 = dma.hbm_to_vmem [thread:$0]  (!%p1991_p6), %s2548_s3, 256, %s1995_s29, [#allocation9], %s1869_s14, %s1869_s14, %s1870_s15  }
  0x5b   : > { %s2549_s4 = sld [smem:[#allocation36_spill]] }
  0x61   : > { %s1498_s16 = scalar_lea.hbm %s2549_s4, 64 }
  0x62   : > { %p1499_p11 = scmp.ne.s32.totalorder %s2549_s4, %s1498_s16  ;;  %p1505_p0 = scmp.lt.u32.totalorder %s1498_s16, %s2549_s4 }
  0x64   : > { %p1501_p12 = pnand %p1499_p11, %p2007_p8 }
  0x66   : > { %p1502_p13 = pneg %p1501_p12 }
  0x68   : > { %p1507_p2 = pnand %p1505_p0, %p1502_p13 }
  0x6a   : > { %1510 = shalt.err (!%p1507_p2)
}
  0x6b   : > { %s1511_s26 = scalar_lea.vmem %s407_s12, 64  ;;  %p1519_p5 = scmp.lt.s32.totalorder %s407_s12, %s407_s12 }
  0x6c   : > { %p1512_p4 = scmp.ne.s32.totalorder %s407_s12, %s1511_s26  ;;  %p1520_p10 = scmp.lt.s32.totalorder %s1511_s26, %s1511_s26 }
  0x6e   : > { %p1514_p7 = pnand %p1512_p4, %p2007_p8  ;;  %p1521_p1 = por %p1520_p10, %p1519_p5 }
  0x70   : > { %p1515_p9 = pneg %p1514_p7 }
  0x72   : > { %p1522_p3 = pnand %p1521_p1, %p1515_p9 }
  0x74   : > { %1525 = shalt.err (!%p1522_p3)
}
  0x75   : > { %1341 = dma.hbm_to_vmem [thread:$0]  (!%p1991_p6), %s2549_s4, 64, %s407_s12, [#allocation9]  }
  0x76   : > { %s1871_s15 = smov [#allocation11]   ;;  %s2550_s5 = sld [smem:[#allocation37_spill]] }
  0x77   : > { %s417_s6 = sshll.u32 %s1871_s15, 4  ;;  %s418_s6 = int_to_ptr.vmem [resolvable:$true] %s417_s6 }
  0x7c   : > { %s1526_s11 = scalar_lea.hbm %s2550_s5, 64 }
  0x7d   : > { %p1527_p11 = scmp.ne.s32.totalorder %s2550_s5, %s1526_s11  ;;  %p1533_p12 = scmp.lt.u32.totalorder %s1526_s11, %s2550_s5 }
  0x7f   : > { %p1529_p1 = pnand %p1527_p11, %p2007_p8 }
  0x81   : > { %p1530_p3 = pneg %p1529_p1 }
  0x83   : > { %p1535_p13 = pnand %p1533_p12, %p1530_p3 }
  0x85   : > { %1538 = shalt.err (!%p1535_p13)
}
  0x86   : > { %s1539_s12 = scalar_lea.vmem %s418_s6, 64  ;;  %p1547_p7 = scmp.lt.s32.totalorder %s418_s6, %s418_s6 }
  0x87   : > { %p1540_p0 = scmp.ne.s32.totalorder %s418_s6, %s1539_s12  ;;  %p1548_p9 = scmp.lt.s32.totalorder %s1539_s12, %s1539_s12 }
  0x89   : > { %p1542_p2 = pnand %p1540_p0, %p2007_p8  ;;  %p1549_p5 = por %p1548_p9, %p1547_p7 }
  0x8b   : > { %p1543_p4 = pneg %p1542_p2 }
  0x8d   : > { %p1550_p10 = pnand %p1549_p5, %p1543_p4 }
  0x8f   : > { %1553 = shalt.err (!%p1550_p10)
}
  0x90   : > { %1344 = dma.hbm_to_vmem [thread:$0]  (!%p1991_p6), %s2550_s5, 64, %s418_s6, [#allocation12]  }
  0x91   : > { %s2522_s10 = sadd.s32 4294967294, %s1864_s22   ;;  %s54_s29 = sadd.s32 1, %s1860_s21 }
  0x92   : > { %p56_p8 = scmp.ge.s32.totalorder %s54_s29, 2  ;;  %s63_s27 = sadd.s32 1, %s1852_s19 }
  0x93   : > { %p70_p11 = scmp.ne.s32.totalorder %s1852_s19, %s1848_s18  ;;  %p71_p1 = scmp.eq.s32.totalorder %s1864_s22, 0 }
  0x94   : > { %s2595_s29 = smov (%p56_p8, %s54_s29), 0  ;;  %p76_p12 = scmp.ne.s32.totalorder %s1848_s18, %s1844_s17 }
  0x95   : > { %2551 = sst [smem:[#allocation31_spill]] %s2595_s29  ;;  %p2096_p3 = por %p71_p1, %p70_p11 }
  0x96   : > { %s58_s15 = ssub.s32 %s1860_s21, %s2595_s29  ;;  %p214_p6 = scmp.eq.s32.totalorder %s1975_s23, 1 }
  0x97   : > { %p61_p13 = scmp.eq.s32.totalorder %s58_s15, 0  ;;  %p2553_p0 = scmp.eq.s32.totalorder %s1975_s23, 0 }
  0x98   : > { %p2111_p4 = por %p214_p6, %p70_p11  ;;  %p220_p7 = scmp.eq.s32.totalorder %s2522_s10, 1 }
  0x99   : > { %p2107_p2 = por %p2553_p0, %p76_p12  ;;  %p1375_p5 = scmp.lt.s32.totalorder %s1864_s22, 2 }
  0x9a   : > { %s2555_s8 = scalar_select %p2111_p4, 1, 0 }
  0x9b   : > { %s2554_s6 = scalar_select %p2107_p2, 1, 0 }
  0x9c   : > { %s2118_s9 = scalar_select %p61_p13, %s1852_s19, %s63_s27  }
  0x9d   : > { %p2120_p9 = por %p220_p7, %p76_p12  ;;  %s428_s16 = sand.u32 1, %s1852_s19  }
  0x9e   : > { %s1247_s25 = sshll.u32 %s1860_s21, 7  ;;  %s2127_s28 = sshll.u32 %s428_s16, 3 }
  0x9f   : > { %s2556_s11 = scalar_select %p2120_p9, 1, 0 }
  0xa0   : > { %s2557_s0 = sld [smem:[#allocation32_spill]]  ;;  %s432_s26 = scalar_lea.vmem [#allocation2], %s2127_s28 }
  0xa1   : > { %s440_s27 = sshll.u32 %s432_s26, 4  ;;  %p2137_p10 = pnand %p1375_p5, %p2096_p3  ;;  %s2141_s27 = int_to_ptr.vmem [resolvable:$true] %s440_s27 }
  0xa2   : > { %s2559_s1 = sld [smem:[#allocation33_spill]]  ;;  %s429_s2 = scalar_lea.sflag [#allocation3], %s428_s16 }
  0xa3   : > { %p1556_p11 = pneg %p2137_p10 }
  0xa6   : > { %s2132_s13 = scalar_lea.hbm %s2557_s0, %s1247_s25  ;;  %s1559_s4 = scalar_lea.hbm %s2557_s0, 256 }
  0xa7   : > { %s1554_s3 = scalar_lea.hbm %s2132_s13, 128  ;;  %p1560_p12 = scmp.lt.u32.totalorder %s2132_s13, %s2557_s0 }
  0xa8   : > { %s2146_s12 = scalar_lea.hbm %s2559_s1, %s1247_s25  ;;  %p1555_p8 = scmp.ne.s32.totalorder %s2132_s13, %s1554_s3 }
  0xa9   : > { %p1561_p6 = scmp.lt.u32.totalorder %s1559_s4, %s1554_s3  ;;  %p1563_p0 = scmp.lt.u32.totalorder %s1554_s3, %s2132_s13 }
  0xaa   : > { %p1557_p1 = pnand %p1556_p11, %p1555_p8 }
  0xab   : > { %p1562_p13 = por %p1561_p6, %p1560_p12 }
  0xac   : > { %p1558_p3 = pneg %p1557_p1 }
  0xad   : > { %p1564_p7 = por %p1563_p0, %p1562_p13 }
  0xaf   : > { %p1565_p5 = pnand %p1564_p7, %p1558_p3 }
  0xb1   : > { %1568 = shalt.err (!%p1565_p5)
}
  0xb2   : > { %s1569_s10 = scalar_lea.vmem %s2141_s27, 128  ;;  %s1872_s16 = smov [#allocation2]  }
  0xb3   : > { %p1570_p8 = scmp.ne.s32.totalorder %s2141_s27, %s1569_s10  ;;  %s1574_s25 = sshll.u32 %s1872_s16, 4  ;;  %s1575_s25 = int_to_ptr.vmem [resolvable:$false] %s1574_s25 }
  0xb4   : > { %s1576_s5 = scalar_lea.vmem %s1575_s25, 256  ;;  %p1577_p4 = scmp.lt.s32.totalorder %s2141_s27, %s1575_s25 }
  0xb5   : > { %p1572_p1 = pnand %p1570_p8, %p1556_p11  ;;  %p1578_p12 = scmp.lt.s32.totalorder %s1576_s5, %s1569_s10 }
  0xb7   : > { %p1573_p9 = pneg %p1572_p1  ;;  %p1579_p6 = por %p1578_p12, %p1577_p4 }
  0xb9   : > { %p1580_p13 = pnand %p1579_p6, %p1573_p9 }
  0xbb   : > { %1583 = shalt.err (!%p1580_p13)
}
  0xbc   : > { %1348 = dma.hbm_to_vmem [thread:$0]  (!%p2137_p10), %s2132_s13, 128, %s2141_s27, %s429_s2  }
  0xbd   : > { %s447_s3 = sand.u32 1, %s1864_s22   ;;  %s451_s4 = scalar_lea.vmem [#allocation5], %s2127_s28 }
  0xbe   : > { %s461_s29 = sshll.u32 %s451_s4, 4  ;;  %s448_s30 = scalar_lea.sflag [#allocation6], %s447_s3  ;;  %s462_s29 = int_to_ptr.vmem [resolvable:$true] %s461_s29 }
  0xbf   : > { %s1584_s14 = scalar_lea.hbm %s2146_s12, 128  ;;  %s1589_s16 = scalar_lea.hbm %s2559_s1, 256 }
  0xc0   : > { %p1585_p4 = scmp.ne.s32.totalorder %s2146_s12, %s1584_s14  ;;  %p1590_p0 = scmp.lt.u32.totalorder %s2146_s12, %s2559_s1 }
  0xc1   : > { %p1591_p7 = scmp.lt.u32.totalorder %s1589_s16, %s1584_s14  ;;  %p1593_p8 = scmp.lt.u32.totalorder %s1584_s14, %s2146_s12 }
  0xc2   : > { %p1587_p9 = pnand %p1585_p4, %p1556_p11 }
  0xc3   : > { %p1592_p5 = por %p1591_p7, %p1590_p0 }
  0xc4   : > { %p1588_p3 = pneg %p1587_p9 }
  0xc5   : > { %p1594_p1 = por %p1593_p8, %p1592_p5 }
  0xc7   : > { %p1595_p12 = pnand %p1594_p1, %p1588_p3 }
  0xc9   : > { %1598 = shalt.err (!%p1595_p12)
}
  0xca   : > { %s1599_s2 = scalar_lea.vmem %s462_s29, 128  ;;  %s1873_s28 = smov [#allocation5]  }
  0xcb   : > { %p1600_p6 = scmp.ne.s32.totalorder %s462_s29, %s1599_s2  ;;  %s1604_s13 = sshll.u32 %s1873_s28, 4  ;;  %s1605_s13 = int_to_ptr.vmem [resolvable:$false] %s1604_s13 }
  0xcc   : > { %s1606_s27 = scalar_lea.vmem %s1605_s13, 256  ;;  %p1607_p9 = scmp.lt.s32.totalorder %s462_s29, %s1605_s13 }
  0xcd   : > { %p1602_p13 = pnand %p1600_p6, %p1556_p11  ;;  %p1608_p2 = scmp.lt.s32.totalorder %s1606_s27, %s1599_s2 }
  0xcf   : > { %p1603_p4 = pneg %p1602_p13  ;;  %p1609_p0 = por %p1608_p2, %p1607_p9 }
  0xd1   : > { %p1610_p7 = pnand %p1609_p0, %p1603_p4 }
  0xd3   : > { %1613 = shalt.err (!%p1610_p7)
}
  0xd4   : > { %1351 = dma.hbm_to_vmem [thread:$0]  (!%p2137_p10), %s2146_s12, 128, %s462_s29, %s448_s30  }
  0xd5   : > { %p2560_p3 = scmp.ne.s32.totalorder %s2544_s24, 0 }
  0xd6   : > { %s2197_s3 = sand.u32 (!%p2560_p3), 1, %s1848_s18   ;;  %p2561_p2 = scmp.ne.s32.totalorder (!%p2560_p3), %s2554_s6, 0 }
  0xd7   : > { %470 = sbr.rel (%p2560_p3) target bundleno = 689 (0x2b1), region = 44  ;;  %s2200_s4 = sshll.u32 (!%p2560_p3), %s2197_s3, 3 }
  0xd8   : > { %s473_s14 = scalar_lea.sflag (!%p2560_p3), [#allocation3], %s2197_s3  ;;  %s476_s26 = scalar_lea.vmem (!%p2560_p3), [#allocation2], %s2200_s4 }
  0xde   : > { %1807 = dma.done.wait (%p2561_p2), %s473_s14, 128  }
  0xdf   : > { %1809 = vsyncadd (%p2561_p2), %s473_s14, 4294967168  ;;  %s2209_s24 = sand.u32 1, %s1975_s23   ;;  %s485_s12 = scalar_lea.vmem [#allocation5], %s2200_s4 }
  0xe0   : > { %s482_s15 = scalar_lea.sflag [#allocation6], %s2209_s24 }
  0xe1   : > { %1811 = dma.done.wait (%p2561_p2), %s482_s15, 128  }
  0xe2   : > { %1813 = vsyncadd (%p2561_p2), %s482_s15, 4294967168  ;;  %p2562_p10 = scmp.eq.s32.totalorder %s1975_s23, 0 }
  0xe4   : > { %1815 = dma.done.wait (%p2562_p10), [#allocation6], 256   ;;  %p2563_p11 = pmov %p2562_p10 }
  0xe5   : > { %p2564_p5 = pmov %p2562_p10 }
  0xe6   : > { %1817 = vsyncadd (%p2563_p11), [#allocation6], 4294967040 }
  0xe7   : > { %1819 = dma.done.wait (%p2564_p5), [#allocation9], 320   ;;  %p2565_p8 = pmov %p2564_p5 }
  0xe8   : > { %p2566_p1 = pmov %p2564_p5 }
  0xe9   : > { %1821 = vsyncadd (%p2565_p8), [#allocation9], 4294966976 }
  0xea   : > { %1823 = dma.done.wait (%p2566_p1), [#allocation12], 64   ;;  %p2567_p12 = pmov %p2566_p1 }
  0xeb   : > { %v1874_v0 = vmov 0.0   ;;  %v1875_v1 = vmov 0   ;;  %vm587_vm0 = vcmask 64512   ;;  %v574_v2 = vld [vmem:[%s476_s26] sm:$0xff]  ;;  %v694_v5 = vld [vmem:[%s485_s12] sm:$0xff]  ;;  %vm707_vm1 = vcmask 1043456  }
  0xec   : > { %1825 = vsyncadd (%p2567_p12), [#allocation12], 4294967232  ;;  %776 = vmatprep.mubr.f32.mxu1 %v1874_v0  ;;  %1439 = vset.pattern.permute.xlu0 %v1875_v1  ;;  %v572_v3 = vld [vmem:[#allocation7] sm:$0xff]  ;;  %v573_v4 = vld [vmem:[#allocation7 + $0x8] sm:$0xff]  ;;  %v702_v7 = vcombine.high %v694_v5, %v694_v5  ;;  %vm703_vm2 = vcmask 31744   ;;  %s2232_s23 = sshll.u32 %s2197_s3, 4 }
  0xed   : > { %1440 = vset.pattern.permute.xlu1 %v1875_v1  ;;  %1295 = vmatprep.subr.mxu0 %v574_v2  ;;  %v695_v6 = vld [vmem:[#allocation11] sm:$0xf]  ;;  %v576_v8 = vld [vmem:[#allocation8 + $0x8] sm:$0xff]  ;;  %v693_v9 = vld [vmem:[#allocation10] sm:$0xf]  ;;  %vm671_vm3 = vcmask 523264  }
  0xee   : > { %1297 = vmatprep.mubr.msk.f32.mxu0 %vm587_vm0, %v572_v3  ;;  %1296 = vmatpush3.msra.mxu0 %v574_v2  ;;  %v575_v10 = vld [vmem:[#allocation8] sm:$0xff]  ;;  %s2235_s6 = scalar_lea.vmem [#allocation13], %s2232_s23  ;;  %s541_s29 = scalar_lea.vmem [#allocation14], %s2200_s4 }
  0xef   : > { %698 = vperm.xlu0 %1439, %v695_v6   ;;  %1298 = vmatmul.mubr.msk.f32.vlgmr.msra.gmra.mrb[0].mxu0 %vm587_vm0, %v573_v4  ;;  %s1289_s30 = sshll.u32 %s1856_s20, 7  ;;  %s2568_s7 = sld [smem:[#allocation39_spill]] }
  0xf0   : > { %584 = vperm.xlu1 %1440, %v576_v8   ;;  %1266 = vmatprep.subr.msk.mxu1 %vm707_vm1, %v702_v7  ;;  %s864_s5 = sshll.u32 %s541_s29, 4  ;;  %s2526_s2 = scalar_lea.sflag [#allocation15], %s2209_s24  ;;  %s865_s5 = int_to_ptr.vmem [resolvable:$true] %s864_s5 }
  0xf1   : > { %1267 = vmatpush1.msk.msra.mxu1 %vm707_vm1, %v694_v5  ;;  %s1614_s28 = scalar_lea.vmem %s865_s5, 128  ;;  %p2569_p13 = scmp.ne.s32.totalorder %s2555_s8, 0 }
  0xf2   : > { %1268 = vmatmul.mubr.msk.f32.vlgmr.msra.gmra.mrb[0].mxu1 %vm703_vm2, %v693_v9  ;;  %p1615_p6 = scmp.ne.s32.totalorder %s865_s5, %s1614_s28  ;;  %s1876_s13 = smov [#allocation14]  }
  0xf3   : > { %579 = vperm.xlu0 %1439, %v575_v10   ;;  %s1618_s27 = sshll.u32 %s1876_s13, 4  ;;  %s1619_s27 = int_to_ptr.vmem [resolvable:$false] %s1618_s27 }
  0xf4   : > { %p1616_p4 = pnand %p1615_p6, %p2569_p13  ;;  %s1620_s4 = scalar_lea.vmem %s1619_s27, 256 }
  0xf5   : > { %s2254_s25 = scalar_lea.hbm %s2568_s7, %s1289_s30  ;;  %p1621_p0 = scmp.lt.s32.totalorder %s865_s5, %s1619_s27 }
  0xf6   : > { %p1617_p9 = pneg %p1616_p4  ;;  %p1622_p7 = scmp.lt.s32.totalorder %s1620_s4, %s1614_s28 }
  0xf8   : > { %p1623_p3 = por %p1622_p7, %p1621_p0 }
  0xfa   : > { %p1624_p2 = pnand %p1623_p3, %p1617_p9 }
 0x16e   : > { %v699_v11 = vpop.permute.xlu0 %698 }
 0x16f   : > { %v585_v12 = vpop.permute.xlu1 %584 }
 0x172   : > { %v580_v14 = vpop.permute.xlu0 %579 }
 0x1c2   : > { %v1299_v13 = vpop.f32.mrb[0].mxu0 }
 0x1c3   : > { %v666_v15 = vadd.f32 %v1299_v13, %v585_v12  ;;  %v660_v16 = vpop.f32.mrb[1].mxu0 }
 0x1c4   : > { %v661_v17 = vadd.f32 %v660_v16, %v580_v14 }
 0x1c5   : > { %v670_v18 = vmax.f32 %v666_v15, 0.0  ;;  %v778_v19 = vpop.f32.mrb[0].mxu1 }
 0x1c6   : > { %v669_v20 = vmax.f32 %v661_v17, 0.0  ;;  %v779_v21 = vadd.f32 %v778_v19, %v699_v11  ;;  %v780_v22 = vpop.f32.mrb[1].mxu1 }
 0x1c7   : > { %673 = vst.msk [vmem:[%s2235_s6 + $0x8] sm:$0xff] %vm671_vm3, %v670_v18  ;;  %v781_v23 = vadd.f32 %v780_v22, %v699_v11  ;;  %v677_v24 = vsel %vm671_vm3, %v670_v18, 0.0  ;;  %v684_v28 = vmul.f32 %v670_v18, %v670_v18 }
 0x1c8   : > { %672 = vst.msk [vmem:[%s2235_s6] sm:$0xff] %vm671_vm3, %v669_v20  ;;  %v783_v25 = vmax.f32 %v779_v21, 0.0  ;;  %678 = vadd.xlane.f32.xlu1 %v677_v24  ;;  %v674_v26 = vsel %vm671_vm3, %v669_v20, 0.0  ;;  %v683_v27 = vmul.f32 %v669_v20, %v669_v20 }
 0x1c9   : > { %v784_v29 = vmax.f32 %v781_v23, 0.0  ;;  %675 = vadd.xlane.f32.xlu0 %v674_v26  ;;  %v688_v36 = vsel %vm671_vm3, %v684_v28, 0.0 }
 0x1ca   : > { %v685_v30 = vsel %vm671_vm3, %v683_v27, 0.0  ;;  %v797_v31 = vmul.f32 %v783_v25, %v783_v25  ;;  %v790_v32 = vsel %vm707_vm1, %v783_v25, 0.0 }
 0x1cb   : > { %v787_v33 = vcombine.low %v783_v25, %v784_v29  ;;  %v798_v34 = vmul.f32 %v784_v29, %v784_v29  ;;  %v791_v35 = vsel %vm707_vm1, %v784_v29, 0.0 }
 0x1cc   : > { %686 = vadd.xlane.f32.xlu1 %v685_v30  ;;  %v799_v37 = vsel %vm707_vm1, %v797_v31, 0.0  ;;  %v792_v38 = vadd.f32 %v791_v35, %v790_v32 }
 0x1cd   : > { %689 = vadd.xlane.f32.xlu0 %v688_v36  ;;  %v800_v39 = vsel %vm707_vm1, %v798_v34, 0.0  ;;  %789 = vst [vmem:[%s541_s29] sm:$0xff] %v787_v33 }
 0x1ce   : > { %v801_v40 = vadd.f32 %v800_v39, %v799_v37 }
 0x1d0   : > { %802 = vadd.xlane.f32.xlu1 %v801_v40 }
 0x1d1   : > { %793 = vadd.xlane.f32.xlu0 %v792_v38 }
 0x1d2   : > { %1627 = shalt.err (!%p1624_p2)
}
 0x1d3   : > { %s1628_s14 = scalar_lea.hbm %s2254_s25, 128  ;;  %s1632_s12 = scalar_lea.hbm %s2568_s7, 256 }
 0x1d4   : > { %p1629_p10 = scmp.ne.s32.totalorder %s2254_s25, %s1628_s14  ;;  %p1633_p8 = scmp.lt.u32.totalorder %s2254_s25, %s2568_s7 }
 0x1d5   : > { %p1634_p1 = scmp.lt.u32.totalorder %s1632_s12, %s1628_s14  ;;  %p1636_p6 = scmp.lt.u32.totalorder %s1628_s14, %s2254_s25 }
 0x1d6   : > { %p1630_p11 = pnand %p1629_p10, %p2569_p13 }
 0x1d7   : > { %p1635_p12 = por %p1634_p1, %p1633_p8 }
 0x1d8   : > { %p1631_p5 = pneg %p1630_p11 }
 0x1d9   : > { %p1637_p4 = por %p1636_p6, %p1635_p12 }
 0x1db   : > { %p1638_p9 = pnand %p1637_p4, %p1631_p5 }
 0x1dd   : > { %1641 = shalt.err (!%p1638_p9)
}
 0x1de   : > { %1321 = dma.vmem_to_hbm [thread:$0]  (%p2569_p13), %s865_s5, 128, %s2254_s25, %s2526_s2  }
 0x1df   : > { %s845_s10 = sshll.u32 %s2235_s6, 4  ;;  %s2278_s16 = sshll.u32 %s1856_s20, 8  ;;  %s2286_s10 = int_to_ptr.vmem [resolvable:$true] %s845_s10 }
 0x1e0   : > { %s2570_s27 = sld [smem:[#allocation38_spill]]  ;;  %s806_s14 = scalar_lea.sflag [#allocation4], %s2197_s3 }
 0x1e1   : > { %s1642_s26 = scalar_lea.vmem %s2286_s10, 256  ;;  %s1877_s6 = smov [#allocation13]  }
 0x1e2   : > { %p1643_p0 = scmp.ne.s32.totalorder %s2286_s10, %s1642_s26  ;;  %s1646_s25 = sshll.u32 %s1877_s6, 4  ;;  %s1647_s25 = int_to_ptr.vmem [resolvable:$false] %s1646_s25 }
 0x1e3   : > { %s1648_s5 = scalar_lea.vmem %s1647_s25, 512  ;;  %p1649_p2 = scmp.lt.s32.totalorder %s2286_s10, %s1647_s25 }
 0x1e4   : > { %p1644_p7 = pnand %p1643_p0, %p2569_p13  ;;  %p1650_p10 = scmp.lt.s32.totalorder %s1648_s5, %s1642_s26 }
 0x1e6   : > { %s2284_s4 = scalar_lea.hbm %s2570_s27, %s2278_s16  ;;  %p1645_p3 = pneg %p1644_p7 }
 0x1e7   : > { %p1651_p11 = por %p1650_p10, %p1649_p2 }
 0x1e9   : > { %p1652_p5 = pnand %p1651_p11, %p1645_p3 }
 0x1eb   : > { %1655 = shalt.err (!%p1652_p5)
}
 0x1ec   : > { %s1656_s15 = scalar_lea.hbm %s2284_s4, 256  ;;  %s1660_s30 = scalar_lea.hbm %s2570_s27, 512 }
 0x1ed   : > { %p1657_p8 = scmp.ne.s32.totalorder %s2284_s4, %s1656_s15  ;;  %p1661_p6 = scmp.lt.u32.totalorder %s2284_s4, %s2570_s27 }
 0x1ee   : > { %p1662_p4 = scmp.lt.u32.totalorder %s1660_s30, %s1656_s15  ;;  %p1664_p0 = scmp.lt.u32.totalorder %s1656_s15, %s2284_s4 }
 0x1ef   : > { %p1658_p1 = pnand %p1657_p8, %p2569_p13 }
 0x1f0   : > { %p1663_p9 = por %p1662_p4, %p1661_p6 }
 0x1f1   : > { %p1659_p12 = pneg %p1658_p1 }
 0x1f2   : > { %p1665_p7 = por %p1664_p0, %p1663_p9 }
 0x1f4   : > { %p1666_p3 = pnand %p1665_p7, %p1659_p12 }
 0x1f6   : > { %1669 = shalt.err (!%p1666_p3)
}
 0x1f7   : > { %s2527_s26 = smov 128   ;;  %s2530_s6 = smov 8   ;;  %vm680_vm4 = vcmask 7168  }
 0x1f8   : > { %1320 = dma.vmem_to_hbm [thread:$0]  (%p2569_p13), %s2286_s10, 256, %s2284_s4, %s806_s14, %s2527_s26, %s2527_s26, %s2530_s6  }
 0x1f9   : > { %s2529_s25 = sshll.u32 %s2197_s3, 2  ;;  %s548_s5 = scalar_lea.vmem [#allocation16], %s2232_s23 }
 0x1fa   : > { %s879_s15 = sshll.u32 %s548_s5, 4  ;;  %s2318_s12 = scalar_lea.vmem [#allocation17], %s2232_s23  ;;  %s2321_s15 = int_to_ptr.vmem [resolvable:$true] %s879_s15 }
 0x1fb   : > { %s897_s29 = sshll.u32 %s2318_s12, 4  ;;  %s2571_s13 = sld [smem:[#allocation40_spill]]  ;;  %s2330_s29 = int_to_ptr.vmem [resolvable:$true] %s897_s29 }
 0x1fc   : > { %s2336_s10 = scalar_lea.vmem [#allocation20], %s2529_s25  ;;  %s1670_s14 = scalar_lea.vmem %s2321_s15, 256 }
 0x1fd   : > { %p1671_p2 = scmp.ne.s32.totalorder %s2321_s15, %s1670_s14  ;;  %s1880_s30 = smov [#allocation16]  }
 0x1fe   : > { %s1674_s28 = sshll.u32 %s1880_s30, 4  ;;  %s1675_s28 = int_to_ptr.vmem [resolvable:$false] %s1674_s28 }
 0x1ff   : > { %p1672_p10 = pnand %p1671_p2, %p2569_p13  ;;  %s1676_s26 = scalar_lea.vmem %s1675_s28, 512 }
 0x200   : > { %p1677_p5 = scmp.lt.s32.totalorder %s2321_s15, %s1675_s28  ;;  %p1678_p8 = scmp.lt.s32.totalorder %s1676_s26, %s1670_s14 }
 0x201   : > { %s2327_s2 = scalar_lea.hbm %s2571_s13, %s2278_s16  ;;  %p1673_p11 = pneg %p1672_p10 }
 0x202   : > { %p1679_p1 = por %p1678_p8, %p1677_p5 }
 0x204   : > { %p1680_p12 = pnand %p1679_p1, %p1673_p11 }
 0x255   : > { %v679_v41 = vpop.xlane.xlu1 %678 }
 0x256   : > { %682 = vst.msk [vmem:[%s548_s5 + $0x8] sm:$0xff] %vm680_vm4, %v679_v41  ;;  %v676_v42 = vpop.xlane.xlu0 %675 }
 0x257   : > { %681 = vst.msk [vmem:[%s548_s5] sm:$0xff] %vm680_vm4, %v676_v42 }
 0x258   : > { %1683 = shalt.err (!%p1680_p12)
}
 0x259   : > { %s1684_s5 = scalar_lea.hbm %s2327_s2, 256  ;;  %s1688_s30 = scalar_lea.hbm %s2571_s13, 512 }
 0x25a   : > { %p1685_p6 = scmp.ne.s32.totalorder %s2327_s2, %s1684_s5  ;;  %p1689_p0 = scmp.lt.u32.totalorder %s2327_s2, %s2571_s13 }
 0x25b   : > { %p1690_p7 = scmp.lt.u32.totalorder %s1688_s30, %s1684_s5  ;;  %p1692_p2 = scmp.lt.u32.totalorder %s1684_s5, %s2327_s2 }
 0x25c   : > { %p1686_p4 = pnand %p1685_p6, %p2569_p13 }
 0x25d   : > { %p1691_p3 = por %p1690_p7, %p1689_p0 }
 0x25e   : > { %p1687_p9 = pneg %p1686_p4 }
 0x25f   : > { %p1693_p10 = por %p1692_p2, %p1691_p3 }
 0x261   : > { %p1694_p11 = pnand %p1693_p10, %p1687_p9 }
 0x263   : > { %1697 = shalt.err (!%p1694_p11)
}
 0x264   : > { %s2572_s26 = smov 128   ;;  %s2573_s14 = scalar_lea.sflag [#allocation15], %s2209_s24  ;;  %v687_v43 = vpop.xlane.xlu1 %686  ;;  %v690_v44 = vpop.xlane.xlu0 %689  ;;  %vm795_vm5 = vcmask 3072  }
 0x265   : > { %1322 = dma.vmem_to_hbm [thread:$0]  (%p2569_p13), %s2321_s15, 256, %s2327_s2, %s2573_s14, %s2572_s26, %s2572_s26, %s2530_s6  }
 0x266   : > { %s2574_s4 = sld [smem:[#allocation41_spill]]  ;;  %691 = vst.msk [vmem:[%s2318_s12] sm:$0xff] %vm680_vm4, %v687_v43  ;;  %s2575_s30 = sshll.u32 %s2197_s3, 2  ;;  %692 = vst.msk [vmem:[%s2318_s12 + $0x8] sm:$0xff] %vm680_vm4, %v690_v44 }
 0x267   : > { %s2375_s28 = scalar_lea.vmem [#allocation19], %s2575_s30  ;;  %s2576_s1 = sshll.u32 %s1856_s20, 6 }
 0x268   : > { %s2577_s14 = sld [smem:[#allocation43_spill]]  ;;  %s1698_s23 = scalar_lea.vmem %s2330_s29, 256 }
 0x269   : > { %p1699_p5 = scmp.ne.s32.totalorder %s2330_s29, %s1698_s23  ;;  %s1881_s30 = smov [#allocation17]  }
 0x26a   : > { %s1702_s0 = sshll.u32 %s1881_s30, 4  ;;  %s1703_s0 = int_to_ptr.vmem [resolvable:$false] %s1702_s0 }
 0x26b   : > { %p1700_p8 = pnand %p1699_p5, %p2569_p13  ;;  %s1704_s12 = scalar_lea.vmem %s1703_s0, 512 }
 0x26c   : > { %s2369_s5 = scalar_lea.hbm %s2574_s4, %s2278_s16  ;;  %s2578_s16 = sshll.u32 %s2336_s10, 4  ;;  %s2389_s16 = int_to_ptr.vmem [resolvable:$true] %s2578_s16 }
 0x26d   : > { %p1701_p1 = pneg %p1700_p8  ;;  %p1705_p12 = scmp.lt.s32.totalorder %s2330_s29, %s1703_s0 }
 0x26e   : > { %s2385_s6 = scalar_lea.hbm %s2577_s14, %s2576_s1  ;;  %p1706_p6 = scmp.lt.s32.totalorder %s1704_s12, %s1698_s23 }
 0x270   : > { %p1707_p4 = por %p1706_p6, %p1705_p12 }
 0x272   : > { %p1708_p9 = pnand %p1707_p4, %p1701_p1 }
 0x274   : > { %1711 = shalt.err (!%p1708_p9)
}
 0x275   : > { %s1712_s1 = scalar_lea.hbm %s2369_s5, 256  ;;  %s1716_s30 = scalar_lea.hbm %s2574_s4, 512 }
 0x276   : > { %p1713_p0 = scmp.ne.s32.totalorder %s2369_s5, %s1712_s1  ;;  %p1717_p2 = scmp.lt.u32.totalorder %s2369_s5, %s2574_s4 }
 0x277   : > { %p1718_p10 = scmp.lt.u32.totalorder %s1716_s30, %s1712_s1  ;;  %p1720_p5 = scmp.lt.u32.totalorder %s1712_s1, %s2369_s5 }
 0x278   : > { %p1714_p7 = pnand %p1713_p0, %p2569_p13 }
 0x279   : > { %p1719_p11 = por %p1718_p10, %p1717_p2 }
 0x27a   : > { %p1715_p3 = pneg %p1714_p7 }
 0x27b   : > { %p1721_p8 = por %p1720_p5, %p1719_p11 }
 0x27d   : > { %p1722_p1 = pnand %p1721_p8, %p1715_p3 }
 0x27f   : > { %1725 = shalt.err (!%p1722_p1)
}
 0x280   : > { %s2579_s23 = smov 8   ;;  %s2580_s12 = scalar_lea.sflag [#allocation18], %s2209_s24  ;;  %v803_v45 = vpop.xlane.xlu1 %802  ;;  %v794_v46 = vpop.xlane.xlu0 %793 }
 0x281   : > { %1323 = dma.vmem_to_hbm [thread:$0]  (%p2569_p13), %s2330_s29, 256, %s2369_s5, %s2580_s12, %s2572_s26, %s2572_s26, %s2579_s23  }
 0x282   : > { %s2581_s25 = sshll.u32 %s1856_s20, 6  ;;  %s2582_s15 = sld [smem:[#allocation42_spill]]  ;;  %804 = vst.msk [vmem:[%s2336_s10] sm:$0xf] %vm795_vm5, %v803_v45  ;;  %796 = vst.msk [vmem:[%s2375_s28] sm:$0xf] %vm795_vm5, %v794_v46 }
 0x283   : > { %s2583_s0 = sshll.u32 %s2375_s28, 4  ;;  %s831_s4 = scalar_lea.sflag [#allocation21], %s2197_s3  ;;  %s2427_s0 = int_to_ptr.vmem [resolvable:$true] %s2583_s0 }
 0x284   : > { %s1726_s7 = scalar_lea.vmem %s2389_s16, 64  ;;  %s1882_s20 = smov [#allocation20]  }
 0x285   : > { %p1727_p12 = scmp.ne.s32.totalorder %s2389_s16, %s1726_s7  ;;  %s1730_s29 = sshll.u32 %s1882_s20, 4  ;;  %s1731_s29 = int_to_ptr.vmem [resolvable:$false] %s1730_s29 }
 0x286   : > { %s1732_s26 = scalar_lea.vmem %s1731_s29, 128  ;;  %p1733_p9 = scmp.lt.s32.totalorder %s2389_s16, %s1731_s29 }
 0x287   : > { %p1728_p6 = pnand %p1727_p12, %p2569_p13  ;;  %p1734_p0 = scmp.lt.s32.totalorder %s1732_s26, %s1726_s7 }
 0x288   : > { %s2423_s30 = scalar_lea.hbm %s2582_s15, %s2581_s25 }
 0x289   : > { %p1729_p4 = pneg %p1728_p6  ;;  %p1735_p7 = por %p1734_p0, %p1733_p9 }
 0x28b   : > { %p1736_p3 = pnand %p1735_p7, %p1729_p4 }
 0x28d   : > { %1739 = shalt.err (!%p1736_p3)
}
 0x28e   : > { %s1740_s3 = scalar_lea.hbm %s2385_s6, 64  ;;  %s1744_s28 = scalar_lea.hbm %s2577_s14, 128 }
 0x28f   : > { %p1741_p2 = scmp.ne.s32.totalorder %s2385_s6, %s1740_s3  ;;  %p1745_p5 = scmp.lt.u32.totalorder %s2385_s6, %s2577_s14 }
 0x290   : > { %p1746_p8 = scmp.lt.u32.totalorder %s1744_s28, %s1740_s3  ;;  %p1748_p12 = scmp.lt.u32.totalorder %s1740_s3, %s2385_s6 }
 0x291   : > { %p1742_p10 = pnand %p1741_p2, %p2569_p13 }
 0x292   : > { %p1747_p1 = por %p1746_p8, %p1745_p5 }
 0x293   : > { %p1743_p11 = pneg %p1742_p10 }
 0x294   : > { %p1749_p6 = por %p1748_p12, %p1747_p1 }
 0x296   : > { %p1750_p4 = pnand %p1749_p6, %p1743_p11 }
 0x298   : > { %1753 = shalt.err (!%p1750_p4)
}
 0x299   : > { %1325 = dma.vmem_to_hbm [thread:$0]  (%p2569_p13), %s2389_s16, 64, %s2385_s6, %s831_s4  }
 0x29a   : > { %s1754_s7 = scalar_lea.vmem %s2427_s0, 64  ;;  %s1883_s25 = smov [#allocation19]  }
 0x29b   : > { %p1755_p9 = scmp.ne.s32.totalorder %s2427_s0, %s1754_s7  ;;  %s1758_s1 = sshll.u32 %s1883_s25, 4  ;;  %s1759_s1 = int_to_ptr.vmem [resolvable:$false] %s1758_s1 }
 0x29c   : > { %s1760_s2 = scalar_lea.vmem %s1759_s1, 128  ;;  %p1761_p3 = scmp.lt.s32.totalorder %s2427_s0, %s1759_s1 }
 0x29d   : > { %p1756_p0 = pnand %p1755_p9, %p2569_p13  ;;  %p1762_p2 = scmp.lt.s32.totalorder %s1760_s2, %s1754_s7 }
 0x29f   : > { %p1757_p7 = pneg %p1756_p0  ;;  %p1763_p10 = por %p1762_p2, %p1761_p3 }
 0x2a1   : > { %p1764_p11 = pnand %p1763_p10, %p1757_p7 }
 0x2a3   : > { %1767 = shalt.err (!%p1764_p11)
}
 0x2a4   : > { %s1768_s6 = scalar_lea.hbm %s2423_s30, 64  ;;  %s1772_s20 = scalar_lea.hbm %s2582_s15, 128 }
 0x2a5   : > { %p1769_p5 = scmp.ne.s32.totalorder %s2423_s30, %s1768_s6  ;;  %p1773_p12 = scmp.lt.u32.totalorder %s2423_s30, %s2582_s15 }
 0x2a6   : > { %p1774_p6 = scmp.lt.u32.totalorder %s1772_s20, %s1768_s6  ;;  %p1776_p9 = scmp.lt.u32.totalorder %s1768_s6, %s2423_s30 }
 0x2a7   : > { %p1770_p8 = pnand %p1769_p5, %p2569_p13 }
 0x2a8   : > { %p1775_p4 = por %p1774_p6, %p1773_p12 }
 0x2a9   : > { %p1771_p1 = pneg %p1770_p8 }
 0x2aa   : > { %p1777_p0 = por %p1776_p9, %p1775_p4 }
 0x2ac   : > { %p1778_p7 = pnand %p1777_p0, %p1771_p1 }
 0x2ae   : > { %1781 = shalt.err (!%p1778_p7)
}
 0x2af   : > { %s2584_s3 = scalar_lea.sflag [#allocation18], %s2209_s24 }
 0x2b0   : > { %1324 = dma.vmem_to_hbm [thread:$0]  (%p2569_p13), %s2427_s0, 64, %s2423_s30, %s2584_s3  }
 0x2b1 PF: > { %s940_s10 = sand.u32 1, %s1844_s17   ;;  %p2585_p3 = scmp.ne.s32.totalorder %s2556_s11, 0 }
 0x2b2   : > { %p2586_p2 = scmp.ge.s32.totalorder %s1864_s22, 2  ;;  %s941_s5 = scalar_lea.sflag [#allocation4], %s940_s10 }
 0x2b4   : > { %p1353_p10 = pnand %p2586_p2, %p2585_p3 }
 0x2b6   : > { %1827 = dma.done.wait (!%p1353_p10), %s941_s5, 256  }
 0x2b7   : > { %1829 = vsyncadd (!%p1353_p10), %s941_s5, 4294967040  ;;  %s2587_s28 = sadd.s32 4294967294, %s1864_s22  }
 0x2b8   : > { %s949_s23 = sand.u32 1, %s2587_s28  }
 0x2b9   : > { %s950_s8 = scalar_lea.sflag [#allocation15], %s949_s23 }
 0x2ba   : > { %1831 = dma.done.wait (!%p1353_p10), %s950_s8, 384  }
 0x2bb   : > { %1833 = vsyncadd (!%p1353_p10), %s950_s8, 4294966912  ;;  %s968_s24 = scalar_lea.sflag [#allocation18], %s949_s23 }
 0x2bc   : > { %1835 = dma.done.wait (!%p1353_p10), %s968_s24, 320  }
 0x2bd   : > { %1837 = vsyncadd (!%p1353_p10), %s968_s24, 4294966976  ;;  %s986_s30 = scalar_lea.sflag [#allocation21], %s940_s10 }
 0x2be   : > { %1839 = dma.done.wait (!%p1353_p10), %s986_s30, 64  }
 0x2bf   : > { %1841 = vsyncadd (!%p1353_p10), %s986_s30, 4294967232  ;;  %s42_s22 = sadd.s32 1, %s1864_s22   ;;  %s2588_s11 = sld [smem:[#allocation31_spill]] }
 0x2c0   : > { %p39_p13 = scmp.ge.s32.totalorder %s42_s22, 4   ;;  %s2589_s17 = smov %s1848_s18 }
 0x2c1   : > { %s2590_s18 = smov %s1852_s19  ;;  %s2591_s19 = smov %s2118_s9 }
 0x2c2   : > { %s2592_s20 = smov %s1860_s21  ;;  %41 = sbr.rel (!%p39_p13) target bundleno = 29 (0x1d), region = 199 }
 0x2c5   : > { %s2593_s21 = smov %s2588_s11 }
 0x2c9   :  { %991 = vsyncpa [#allocation3], 1 }
 0x2ca   :  { %993 = vsyncpa [#allocation3 + $0x1], 1 }
 0x2cb   :  { %994 = vsyncpa [#allocation6], 1 }
 0x2cc   :  { %996 = vsyncpa [#allocation6 + $0x1], 1 }
 0x2cd   :  { %997 = vsyncpa [#allocation9], 1 }
 0x2ce   :  { %998 = vsyncpa [#allocation12], 1 }
 0x2cf   :  { %999 = vsyncpa [#allocation4], 1 }
 0x2d0   :  { %1001 = vsyncpa [#allocation4 + $0x1], 1 }
 0x2d1   :  { %1002 = vsyncpa [#allocation15], 1 }
 0x2d2   :  { %1004 = vsyncpa [#allocation15 + $0x1], 1 }
 0x2d3   :  { %1005 = vsyncpa [#allocation18], 1 }
 0x2d4   :  { %1007 = vsyncpa [#allocation18 + $0x1], 1 }
 0x2d5   :  { %1008 = vsyncpa [#allocation21], 1 }
 0x2d6   :  { %1010 = vsyncpa [#allocation21 + $0x1], 1 }

</bundles_post_ra>
